<compile_context>
chip_gen: v7x
topology: tpu7x:2x2x1
jax: 0.10.0
libtpu: 0.0.40
codegen_flags: <defaults>
</compile_context>

<pallas_src>
import jax
import jax.numpy as jnp
import numpy as np
from jax.experimental import pallas as pl
from jax.experimental.pallas import tpu as pltpu

EPS = 1e-5  # nn.LayerNorm default


def _round_up(x, m):
    return (x + m - 1) // m * m


def _segment_layernorm(x, bounds):
    """LayerNorm (no affine) applied independently to lane segments.

    `bounds` are the cumulative segment ends, e.g. (32, 48, 80, 96) for
    segments [0:32), [32:48), [48:80), [80:96).  bounds[-1] == x.shape[-1].
    Uses masked full-width reductions (exact f32) + a where-chain broadcast,
    so no minor-dim slicing / relayout is needed.
    """
    n = x.shape[-1]
    lane = jax.lax.broadcasted_iota(jnp.int32, (1, n), 1)
    x2 = x * x

    # Prefix sums up to every interior boundary; the last one is the full row.
    ps, pq = [], []
    for b in bounds[:-1]:
        m = lane < b
        ps.append(jnp.sum(jnp.where(m, x, 0.0), axis=-1, keepdims=True))
        pq.append(jnp.sum(jnp.where(m, x2, 0.0), axis=-1, keepdims=True))
    ps.append(jnp.sum(x, axis=-1, keepdims=True))
    pq.append(jnp.sum(x2, axis=-1, keepdims=True))

    mus, invs = [], []
    prev_s = prev_q = 0.0
    prev_b = 0
    for i, b in enumerate(bounds):
        inv_n = 1.0 / (b - prev_b)
        mu = (ps[i] - prev_s) * inv_n
        ex2 = (pq[i] - prev_q) * inv_n
        # One-pass variance (E[x^2] - mu^2); clamp guards tiny cancellation.
        var = jnp.maximum(ex2 - mu * mu, 0.0)
        mus.append(mu)
        invs.append(jax.lax.rsqrt(var + EPS))
        prev_s, prev_q, prev_b = ps[i], pq[i], b

    mu_b, inv_b = mus[-1], invs[-1]
    for i in range(len(bounds) - 2, -1, -1):
        m = lane < bounds[i]
        mu_b = jnp.where(m, mus[i], mu_b)
        inv_b = jnp.where(m, invs[i], inv_b)
    return (x - mu_b) * inv_b


def _make_kernel(cat2, out2, bounds1, bounds2):
    """cat2 = 2*(feat_out+ctx_out), out2 = 2*out_dim (two batch rows per kernel row)."""

    def kernel(x_ref, w1_ref, w2_ref, c_ref, out_ref):
        cdt = w1_ref.dtype  # MXU input dtype (bf16 fast path / f32 exact path)

        # Stage 1: fused feature+context Linear (block-diagonal) + ReLU,
        # then per-branch LayerNorm (affine already folded into W2/b2).
        h = jnp.dot(x_ref[...], w1_ref[...], preferred_element_type=jnp.float32)
        h = jnp.maximum(h + c_ref[0:1, :cat2], 0.0)
        h = _segment_layernorm(h, bounds1)

        # Stage 2: output mixer (branch-LN affine folded in) + ReLU.
        o = jnp.dot(h.astype(cdt), w2_ref[...], preferred_element_type=jnp.float32)
        o = jnp.maximum(o + c_ref[1:2, :out2], 0.0)

        # Final LayerNorm (per packed half) with its affine.
        o = _segment_layernorm(o, bounds2)
        o = o * c_ref[2:3, :out2] + c_ref[3:4, :out2]

        out_ref[...] = o.astype(out_ref.dtype)

    return kernel


def _prepare_params(params, feat_in, ctx_in, feat_out, ctx_out, out_dim, cdt):
    """Fold + fuse + duplicate the module parameters for the packed kernel."""
    f32 = jnp.float32
    cat = feat_out + ctx_out
    wf = params["wf"].astype(f32)
    wc = params["wc"].astype(f32)
    wo = params["wo"].astype(f32)
    bf = params["bf"].reshape(1, feat_out).astype(f32)
    bc = params["bc"].reshape(1, ctx_out).astype(f32)
    gf = params["gf"].reshape(1, feat_out).astype(f32)
    betaf = params["betaf"].reshape(1, feat_out).astype(f32)
    gc = params["gc"].reshape(1, ctx_out).astype(f32)
    betac = params["betac"].reshape(1, ctx_out).astype(f32)
    bo = params["bo"].reshape(1, out_dim).astype(f32)
    go = params["go"].reshape(1, out_dim).astype(f32)
    betao = params["betao"].reshape(1, out_dim).astype(f32)

    # Stage 1: concat(feat, ctx) @ blockdiag(Wf, Wc) == [feat@Wf, ctx@Wc]
    w1 = jnp.zeros((feat_in + ctx_in, cat), f32)
    w1 = w1.at[:feat_in, :feat_out].set(wf).at[feat_in:, feat_out:].set(wc)
    b1 = jnp.concatenate([bf, bc], axis=-1)

    # Fold branch-LayerNorm affine into the output mixer:
    #   (x_hat*g + beta) @ Wo + bo == x_hat @ (diag(g) Wo) + (beta @ Wo + bo)
    g_cat = jnp.concatenate([gf, gc], axis=-1)
    beta_cat = jnp.concatenate([betaf, betac], axis=-1)
    w2 = wo * g_cat.reshape(-1, 1)
    b2 = bo + beta_cat @ wo

    # Pack two batch rows per kernel row -> duplicate block-diagonally.
    def blkdiag2(w):
        k, n = w.shape
        return jnp.zeros((2 * k, 2 * n), f32).at[:k, :n].set(w).at[k:, n:].set(w)

    w1_2 = blkdiag2(w1).astype(cdt)
    w2_2 = blkdiag2(w2).astype(cdt)

    cmax = max(2 * cat, 2 * out_dim)

    def row(v):
        v2 = jnp.tile(v, (1, 2))
        return jnp.pad(v2, ((0, 0), (0, cmax - v2.shape[1])))

    # Single packed constant operand: rows = [b1, b2, gamma_out, beta_out, 0...]
    consts = jnp.concatenate(
        [row(b1), row(b2), row(go), row(betao), jnp.zeros((4, cmax), f32)], axis=0)
    return w1_2, w2_2, consts


def base_station_embedding(feat, context, params, *, tile_rows=2048, use_bf16=True):
    """Fused BaseStationEmbedding forward.  tile_rows = packed rows per grid step
    (one packed row = two batch rows)."""
    B, feat_in = feat.shape
    _, ctx_in = context.shape
    feat_out = params["wf"].shape[1]
    ctx_out = params["wc"].shape[1]
    out_dim = params["wo"].shape[1]
    cat = feat_out + ctx_out

    cdt = jnp.bfloat16 if use_bf16 else jnp.float32
    csize = 2 if use_bf16 else 4
    in2, cat2, out2 = 2 * (feat_in + ctx_in), 2 * cat, 2 * out_dim
    bounds1 = (feat_out, cat, cat + feat_out, cat2)
    bounds2 = (out_dim, out2)

    w1_2, w2_2, consts = _prepare_params(
        params, feat_in, ctx_in, feat_out, ctx_out, out_dim, cdt)

    # ---- batch tiling: minimal padding, big tiles, >=2 steps only when the
    #      batch is large enough that each step still carries >~1 MB ----------
    SUB = 16                                   # sublane group (covers bf16 & f32)
    rp = -(-B // 2)                            # packed rows needed
    rp_sub = _round_up(max(rp, 1), SUB)
    steps = max(1, -(-rp_sub // max(tile_rows, SUB)))
    tr = _round_up(-(-rp_sub // steps), SUB)   # packed rows per step
    rp_pad = tr * steps
    b_pad = 2 * rp_pad

    # Merge + pad + pack the inputs (row-major reshape is free in XLA).
    x = jnp.concatenate([feat, context], axis=-1).astype(cdt)
    x = jnp.pad(x, ((0, b_pad - B), (0, 0))).reshape(rp_pad, in2)

    # ---- compiler params: raise scoped VMEM only when actually needed -------
    lane = lambda n: _round_up(n, 128)
    vmem_est = tr * (2 * lane(in2) * csize        # input tile, double-buffered
                     + 2 * lane(out2) * 4         # output tile, double-buffered
                     + 8 * lane(max(cat2, out2)) * 4)   # live f32 temporaries
    vmem_est += 2 * (w1_2.size * csize + w2_2.size * csize + consts.size * 4)
    cp_kwargs = dict(dimension_semantics=("parallel",))
    if vmem_est > (12 << 20):
        # Only reachable with very large user-requested tiles (v5e default
        # scoped limit is 16 MiB).  TODO(synk): clamp per-chip (v7x has 64 MiB).
        cp_kwargs["vmem_limit_bytes"] = int(vmem_est + (8 << 20))

    flops = 2 * B * (feat_in * feat_out + ctx_in * ctx_out + cat * out_dim)
    bytes_accessed = (B * (feat_in + ctx_in) * csize + B * out_dim * 4
                      + w1_2.size * csize + w2_2.size * csize + consts.size * 4)

    kernel = _make_kernel(cat2, out2, bounds1, bounds2)

    out = pl.pallas_call(
        kernel,
        out_shape=jax.ShapeDtypeStruct((rp_pad, out2), jnp.float32),
        grid_spec=pltpu.PrefetchScalarGridSpec(
            num_scalar_prefetch=0,
            grid=(steps,),
            in_specs=[
                pl.BlockSpec((tr, in2), lambda i: (i, 0)),
                pl.BlockSpec(w1_2.shape, lambda i: (0, 0)),
                pl.BlockSpec(w2_2.shape, lambda i: (0, 0)),
                pl.BlockSpec(consts.shape, lambda i: (0, 0)),
            ],
            out_specs=pl.BlockSpec((tr, out2), lambda i: (i, 0)),
        ),
        compiler_params=pltpu.CompilerParams(**cp_kwargs),
        cost_estimate=pl.CostEstimate(flops=flops, transcendentals=3 * B,
                                      bytes_accessed=bytes_accessed),
    )(x, w1_2, w2_2, consts)

    # Free row-major reshape back to (batch, out_dim); drop padded rows.
    return out.reshape(b_pad, out_dim)[:B]


def init_params(key, feat_in, feat_out, ctx_in, ctx_out, out_dim):
    """Synthetic parameters.  Linear weights ~ U[-1/sqrt(fan_in), 1/sqrt(fan_in)];
    LayerNorm gamma/beta randomized (instead of PyTorch's 1/0 defaults) so the
    affine-folding path is actually exercised by the test."""
    ks = jax.random.split(key, 14)
    u = lambda k, shape, fan: jax.random.uniform(
        k, shape, jnp.float32, -1.0 / np.sqrt(fan), 1.0 / np.sqrt(fan))
    cat = feat_out + ctx_out
    return dict(
        wf=u(ks[0], (feat_in, feat_out), feat_in),
        bf=u(ks[1], (1, feat_out), feat_in),
        gf=1.0 + 0.1 * jax.random.normal(ks[2], (1, feat_out), jnp.float32),
        betaf=0.1 * jax.random.normal(ks[3], (1, feat_out), jnp.float32),
        wc=u(ks[4], (ctx_in, ctx_out), ctx_in),
        bc=u(ks[5], (1, ctx_out), ctx_in),
        gc=1.0 + 0.1 * jax.random.normal(ks[6], (1, ctx_out), jnp.float32),
        betac=0.1 * jax.random.normal(ks[7], (1, ctx_out), jnp.float32),
        wo=u(ks[8], (cat, out_dim), cat),
        bo=u(ks[9], (1, out_dim), cat),
        go=1.0 + 0.1 * jax.random.normal(ks[10], (1, out_dim), jnp.float32),
        betao=0.1 * jax.random.normal(ks[11], (1, out_dim), jnp.float32),
    )


def reference_forward(feat, context, p):
    """Pure-JAX reference mirroring the PyTorch module (eval mode, f32)."""
    def ln(x, g, b):
        mu = x.mean(-1, keepdims=True)
        var = ((x - mu) ** 2).mean(-1, keepdims=True)
        return (x - mu) / jnp.sqrt(var + EPS) * g + b

    f = ln(jnp.maximum(feat @ p["wf"] + p["bf"], 0.0), p["gf"], p["betaf"])
    c = ln(jnp.maximum(context @ p["wc"] + p["bc"], 0.0), p["gc"], p["betac"])
    x = jnp.concatenate([f, c], axis=-1)
    o = jnp.maximum(x @ p["wo"] + p["bo"], 0.0)
    return ln(o, p["go"], p["betao"])


if __name__ == "__main__":
    # Small shapes consistent with the module's forward.
    B = 16
    feat_in, feat_out = 12, 32
    ctx_in, ctx_out = 6, 16
    out_dim = 64

    key = jax.random.PRNGKey(0)
    kf, kc, kp = jax.random.split(key, 3)
    feat = jax.random.normal(kf, (B, feat_in), jnp.float32)
    context = jax.random.normal(kc, (B, ctx_in), jnp.float32)
    params = init_params(kp, feat_in, feat_out, ctx_in, ctx_out, out_dim)

    ref = np.asarray(reference_forward(feat, context, params))

    # f32 path: correctness gate.  Tolerance covers the possibility that the
    # MXU runs f32 matmuls as bf16 passes under default matmul precision.
    out_f32 = jax.block_until_ready(
        base_station_embedding(feat, context, params, use_bf16=False))
    np.testing.assert_allclose(np.asarray(out_f32), ref, rtol=3e-2, atol=3e-2)

    # Default fast path: bf16 MXU inputs, f32 accumulation / LayerNorm math.
    out_bf16 = jax.block_until_ready(
        base_station_embedding(feat, context, params, use_bf16=True))
    np.testing.assert_allclose(np.asarray(out_bf16), ref, rtol=0.15, atol=0.15)

    print("KERNEL_OK")
</pallas_src>

<mosaic_0001>
module attributes {stable_mosaic.version = 11 : i64} {
  func.func @kernel(%arg0: i32, %arg1: memref<16x36xf32, #tpu.memory_space<vmem>>, %arg2: memref<36x96xf32, #tpu.memory_space<vmem>>, %arg3: memref<96x128xf32, #tpu.memory_space<vmem>>, %arg4: memref<8x128xf32, #tpu.memory_space<vmem>>, %arg5: memref<16x128xf32, #tpu.memory_space<vmem>>) attributes {dimension_semantics = [#tpu.dimension_semantics<parallel>], iteration_bounds = array<i64: 1>, scalar_prefetch = 0 : i64, scratch_operands = 0 : i64, tpu.core_type = #tpu.core_type<tc>, window_params = [{transform_indices = @transform_0, window_bounds = array<i64: 16, 36>}, {pipeline_mode = #tpu.pipeline_mode<synchronous>, transform_indices = @transform_1, window_bounds = array<i64: 36, 96>}, {pipeline_mode = #tpu.pipeline_mode<synchronous>, transform_indices = @transform_2, window_bounds = array<i64: 96, 128>}, {pipeline_mode = #tpu.pipeline_mode<synchronous>, transform_indices = @transform_3, window_bounds = array<i64: 8, 128>}, {transform_indices = @transform_4, window_bounds = array<i64: 16, 128>}]} {
    %c0 = arith.constant 0 : index
    %c0_0 = arith.constant 0 : index
    %0 = vector.load %arg1[%c0, %c0_0] : memref<16x36xf32, #tpu.memory_space<vmem>>, vector<16x36xf32>
    %c0_1 = arith.constant 0 : index
    %c0_2 = arith.constant 0 : index
    %1 = vector.load %arg2[%c0_1, %c0_2] : memref<36x96xf32, #tpu.memory_space<vmem>>, vector<36x96xf32>
    %cst = arith.constant dense<0.000000e+00> : vector<16x96xf32>
    %2 = tpu.matmul %0, %1, %cst {dimension_numbers = #tpu.dot_dimension_numbers<[1], [0], [0], [1], [0, 0, 1, 1], [], []>} : vector<16x36xf32>, vector<36x96xf32>, vector<16x96xf32> -> vector<16x96xf32>
    %c0_3 = arith.constant 0 : index
    %c0_4 = arith.constant 0 : index
    %3 = vector.load %arg4[%c0_3, %c0_4] : memref<8x128xf32, #tpu.memory_space<vmem>>, vector<1x96xf32>
    %4 = vector.broadcast %3 : vector<1x96xf32> to vector<16x96xf32>
    %5 = arith.addf %2, %4 : vector<16x96xf32>
    %cst_5 = arith.constant 0.000000e+00 : f32
    %6 = vector.broadcast %cst_5 : f32 to vector<16x96xf32>
    %7 = arith.maximumf %5, %6 : vector<16x96xf32>
    %8 = tpu.iota {dimensions = array<i32: 1>} : vector<1x96xi32>
    %9 = arith.mulf %7, %7 : vector<16x96xf32>
    %c32_i32 = arith.constant 32 : i32
    %10 = vector.broadcast %c32_i32 : i32 to vector<1x96xi32>
    %11 = arith.cmpi slt, %8, %10 : vector<1x96xi32>
    %cst_6 = arith.constant 0.000000e+00 : f32
    %12 = vector.shape_cast %11 : vector<1x96xi1> to vector<1x96xi1>
    %13 = vector.broadcast %12 : vector<1x96xi1> to vector<16x96xi1>
    %14 = vector.broadcast %cst_6 : f32 to vector<16x96xf32>
    %15 = arith.select %13, %7, %14 : vector<16x96xi1>, vector<16x96xf32>
    %cst_7 = arith.constant dense<0.000000e+00> : vector<16xf32>
    %16 = vector.multi_reduction <add>, %15, %cst_7 [1] : vector<16x96xf32> to vector<16xf32>
    %17 = vector.shape_cast %16 : vector<16xf32> to vector<16x1xf32>
    %cst_8 = arith.constant 0.000000e+00 : f32
    %18 = vector.shape_cast %11 : vector<1x96xi1> to vector<1x96xi1>
    %19 = vector.broadcast %18 : vector<1x96xi1> to vector<16x96xi1>
    %20 = vector.broadcast %cst_8 : f32 to vector<16x96xf32>
    %21 = arith.select %19, %9, %20 : vector<16x96xi1>, vector<16x96xf32>
    %cst_9 = arith.constant dense<0.000000e+00> : vector<16xf32>
    %22 = vector.multi_reduction <add>, %21, %cst_9 [1] : vector<16x96xf32> to vector<16xf32>
    %23 = vector.shape_cast %22 : vector<16xf32> to vector<16x1xf32>
    %c48_i32 = arith.constant 48 : i32
    %24 = vector.broadcast %c48_i32 : i32 to vector<1x96xi32>
    %25 = arith.cmpi slt, %8, %24 : vector<1x96xi32>
    %cst_10 = arith.constant 0.000000e+00 : f32
    %26 = vector.shape_cast %25 : vector<1x96xi1> to vector<1x96xi1>
    %27 = vector.broadcast %26 : vector<1x96xi1> to vector<16x96xi1>
    %28 = vector.broadcast %cst_10 : f32 to vector<16x96xf32>
    %29 = arith.select %27, %7, %28 : vector<16x96xi1>, vector<16x96xf32>
    %cst_11 = arith.constant dense<0.000000e+00> : vector<16xf32>
    %30 = vector.multi_reduction <add>, %29, %cst_11 [1] : vector<16x96xf32> to vector<16xf32>
    %31 = vector.shape_cast %30 : vector<16xf32> to vector<16x1xf32>
    %cst_12 = arith.constant 0.000000e+00 : f32
    %32 = vector.shape_cast %25 : vector<1x96xi1> to vector<1x96xi1>
    %33 = vector.broadcast %32 : vector<1x96xi1> to vector<16x96xi1>
    %34 = vector.broadcast %cst_12 : f32 to vector<16x96xf32>
    %35 = arith.select %33, %9, %34 : vector<16x96xi1>, vector<16x96xf32>
    %cst_13 = arith.constant dense<0.000000e+00> : vector<16xf32>
    %36 = vector.multi_reduction <add>, %35, %cst_13 [1] : vector<16x96xf32> to vector<16xf32>
    %37 = vector.shape_cast %36 : vector<16xf32> to vector<16x1xf32>
    %c80_i32 = arith.constant 80 : i32
    %38 = vector.broadcast %c80_i32 : i32 to vector<1x96xi32>
    %39 = arith.cmpi slt, %8, %38 : vector<1x96xi32>
    %cst_14 = arith.constant 0.000000e+00 : f32
    %40 = vector.shape_cast %39 : vector<1x96xi1> to vector<1x96xi1>
    %41 = vector.broadcast %40 : vector<1x96xi1> to vector<16x96xi1>
    %42 = vector.broadcast %cst_14 : f32 to vector<16x96xf32>
    %43 = arith.select %41, %7, %42 : vector<16x96xi1>, vector<16x96xf32>
    %cst_15 = arith.constant dense<0.000000e+00> : vector<16xf32>
    %44 = vector.multi_reduction <add>, %43, %cst_15 [1] : vector<16x96xf32> to vector<16xf32>
    %45 = vector.shape_cast %44 : vector<16xf32> to vector<16x1xf32>
    %cst_16 = arith.constant 0.000000e+00 : f32
    %46 = vector.shape_cast %39 : vector<1x96xi1> to vector<1x96xi1>
    %47 = vector.broadcast %46 : vector<1x96xi1> to vector<16x96xi1>
    %48 = vector.broadcast %cst_16 : f32 to vector<16x96xf32>
    %49 = arith.select %47, %9, %48 : vector<16x96xi1>, vector<16x96xf32>
    %cst_17 = arith.constant dense<0.000000e+00> : vector<16xf32>
    %50 = vector.multi_reduction <add>, %49, %cst_17 [1] : vector<16x96xf32> to vector<16xf32>
    %51 = vector.shape_cast %50 : vector<16xf32> to vector<16x1xf32>
    %cst_18 = arith.constant dense<0.000000e+00> : vector<16xf32>
    %52 = vector.multi_reduction <add>, %7, %cst_18 [1] : vector<16x96xf32> to vector<16xf32>
    %53 = vector.shape_cast %52 : vector<16xf32> to vector<16x1xf32>
    %cst_19 = arith.constant dense<0.000000e+00> : vector<16xf32>
    %54 = vector.multi_reduction <add>, %9, %cst_19 [1] : vector<16x96xf32> to vector<16xf32>
    %55 = vector.shape_cast %54 : vector<16xf32> to vector<16x1xf32>
    %cst_20 = arith.constant 0.000000e+00 : f32
    %56 = vector.broadcast %cst_20 : f32 to vector<16x1xf32>
    %57 = arith.subf %17, %56 : vector<16x1xf32>
    %cst_21 = arith.constant 3.125000e-02 : f32
    %58 = vector.broadcast %cst_21 : f32 to vector<16x1xf32>
    %59 = arith.mulf %57, %58 : vector<16x1xf32>
    %cst_22 = arith.constant 0.000000e+00 : f32
    %60 = vector.broadcast %cst_22 : f32 to vector<16x1xf32>
    %61 = arith.subf %23, %60 : vector<16x1xf32>
    %cst_23 = arith.constant 3.125000e-02 : f32
    %62 = vector.broadcast %cst_23 : f32 to vector<16x1xf32>
    %63 = arith.mulf %61, %62 : vector<16x1xf32>
    %64 = arith.mulf %59, %59 : vector<16x1xf32>
    %65 = arith.subf %63, %64 : vector<16x1xf32>
    %cst_24 = arith.constant 0.000000e+00 : f32
    %66 = vector.broadcast %cst_24 : f32 to vector<16x1xf32>
    %67 = arith.maximumf %65, %66 : vector<16x1xf32>
    %cst_25 = arith.constant 9.99999974E-6 : f32
    %68 = vector.broadcast %cst_25 : f32 to vector<16x1xf32>
    %69 = arith.addf %67, %68 : vector<16x1xf32>
    %70 = math.rsqrt %69 : vector<16x1xf32>
    %71 = arith.subf %31, %17 : vector<16x1xf32>
    %cst_26 = arith.constant 6.250000e-02 : f32
    %72 = vector.broadcast %cst_26 : f32 to vector<16x1xf32>
    %73 = arith.mulf %71, %72 : vector<16x1xf32>
    %74 = arith.subf %37, %23 : vector<16x1xf32>
    %cst_27 = arith.constant 6.250000e-02 : f32
    %75 = vector.broadcast %cst_27 : f32 to vector<16x1xf32>
    %76 = arith.mulf %74, %75 : vector<16x1xf32>
    %77 = arith.mulf %73, %73 : vector<16x1xf32>
    %78 = arith.subf %76, %77 : vector<16x1xf32>
    %cst_28 = arith.constant 0.000000e+00 : f32
    %79 = vector.broadcast %cst_28 : f32 to vector<16x1xf32>
    %80 = arith.maximumf %78, %79 : vector<16x1xf32>
    %cst_29 = arith.constant 9.99999974E-6 : f32
    %81 = vector.broadcast %cst_29 : f32 to vector<16x1xf32>
    %82 = arith.addf %80, %81 : vector<16x1xf32>
    %83 = math.rsqrt %82 : vector<16x1xf32>
    %84 = arith.subf %45, %31 : vector<16x1xf32>
    %cst_30 = arith.constant 3.125000e-02 : f32
    %85 = vector.broadcast %cst_30 : f32 to vector<16x1xf32>
    %86 = arith.mulf %84, %85 : vector<16x1xf32>
    %87 = arith.subf %51, %37 : vector<16x1xf32>
    %cst_31 = arith.constant 3.125000e-02 : f32
    %88 = vector.broadcast %cst_31 : f32 to vector<16x1xf32>
    %89 = arith.mulf %87, %88 : vector<16x1xf32>
    %90 = arith.mulf %86, %86 : vector<16x1xf32>
    %91 = arith.subf %89, %90 : vector<16x1xf32>
    %cst_32 = arith.constant 0.000000e+00 : f32
    %92 = vector.broadcast %cst_32 : f32 to vector<16x1xf32>
    %93 = arith.maximumf %91, %92 : vector<16x1xf32>
    %cst_33 = arith.constant 9.99999974E-6 : f32
    %94 = vector.broadcast %cst_33 : f32 to vector<16x1xf32>
    %95 = arith.addf %93, %94 : vector<16x1xf32>
    %96 = math.rsqrt %95 : vector<16x1xf32>
    %97 = arith.subf %53, %45 : vector<16x1xf32>
    %cst_34 = arith.constant 6.250000e-02 : f32
    %98 = vector.broadcast %cst_34 : f32 to vector<16x1xf32>
    %99 = arith.mulf %97, %98 : vector<16x1xf32>
    %100 = arith.subf %55, %51 : vector<16x1xf32>
    %cst_35 = arith.constant 6.250000e-02 : f32
    %101 = vector.broadcast %cst_35 : f32 to vector<16x1xf32>
    %102 = arith.mulf %100, %101 : vector<16x1xf32>
    %103 = arith.mulf %99, %99 : vector<16x1xf32>
    %104 = arith.subf %102, %103 : vector<16x1xf32>
    %cst_36 = arith.constant 0.000000e+00 : f32
    %105 = vector.broadcast %cst_36 : f32 to vector<16x1xf32>
    %106 = arith.maximumf %104, %105 : vector<16x1xf32>
    %cst_37 = arith.constant 9.99999974E-6 : f32
    %107 = vector.broadcast %cst_37 : f32 to vector<16x1xf32>
    %108 = arith.addf %106, %107 : vector<16x1xf32>
    %109 = math.rsqrt %108 : vector<16x1xf32>
    %c80_i32_38 = arith.constant 80 : i32
    %110 = vector.broadcast %c80_i32_38 : i32 to vector<1x96xi32>
    %111 = arith.cmpi slt, %8, %110 : vector<1x96xi32>
    %112 = vector.shape_cast %111 : vector<1x96xi1> to vector<1x96xi1>
    %113 = vector.broadcast %112 : vector<1x96xi1> to vector<16x96xi1>
    %114 = vector.shape_cast %86 : vector<16x1xf32> to vector<16x1xf32>
    %115 = vector.broadcast %114 : vector<16x1xf32> to vector<16x96xf32>
    %116 = vector.shape_cast %99 : vector<16x1xf32> to vector<16x1xf32>
    %117 = vector.broadcast %116 : vector<16x1xf32> to vector<16x96xf32>
    %118 = arith.select %113, %115, %117 : vector<16x96xi1>, vector<16x96xf32>
    %119 = vector.shape_cast %111 : vector<1x96xi1> to vector<1x96xi1>
    %120 = vector.broadcast %119 : vector<1x96xi1> to vector<16x96xi1>
    %121 = vector.shape_cast %96 : vector<16x1xf32> to vector<16x1xf32>
    %122 = vector.broadcast %121 : vector<16x1xf32> to vector<16x96xf32>
    %123 = vector.shape_cast %109 : vector<16x1xf32> to vector<16x1xf32>
    %124 = vector.broadcast %123 : vector<16x1xf32> to vector<16x96xf32>
    %125 = arith.select %120, %122, %124 : vector<16x96xi1>, vector<16x96xf32>
    %c48_i32_39 = arith.constant 48 : i32
    %126 = vector.broadcast %c48_i32_39 : i32 to vector<1x96xi32>
    %127 = arith.cmpi slt, %8, %126 : vector<1x96xi32>
    %128 = vector.shape_cast %127 : vector<1x96xi1> to vector<1x96xi1>
    %129 = vector.broadcast %128 : vector<1x96xi1> to vector<16x96xi1>
    %130 = vector.shape_cast %73 : vector<16x1xf32> to vector<16x1xf32>
    %131 = vector.broadcast %130 : vector<16x1xf32> to vector<16x96xf32>
    %132 = arith.select %129, %131, %118 : vector<16x96xi1>, vector<16x96xf32>
    %133 = vector.shape_cast %127 : vector<1x96xi1> to vector<1x96xi1>
    %134 = vector.broadcast %133 : vector<1x96xi1> to vector<16x96xi1>
    %135 = vector.shape_cast %83 : vector<16x1xf32> to vector<16x1xf32>
    %136 = vector.broadcast %135 : vector<16x1xf32> to vector<16x96xf32>
    %137 = arith.select %134, %136, %125 : vector<16x96xi1>, vector<16x96xf32>
    %c32_i32_40 = arith.constant 32 : i32
    %138 = vector.broadcast %c32_i32_40 : i32 to vector<1x96xi32>
    %139 = arith.cmpi slt, %8, %138 : vector<1x96xi32>
    %140 = vector.shape_cast %139 : vector<1x96xi1> to vector<1x96xi1>
    %141 = vector.broadcast %140 : vector<1x96xi1> to vector<16x96xi1>
    %142 = vector.shape_cast %59 : vector<16x1xf32> to vector<16x1xf32>
    %143 = vector.broadcast %142 : vector<16x1xf32> to vector<16x96xf32>
    %144 = arith.select %141, %143, %132 : vector<16x96xi1>, vector<16x96xf32>
    %145 = vector.shape_cast %139 : vector<1x96xi1> to vector<1x96xi1>
    %146 = vector.broadcast %145 : vector<1x96xi1> to vector<16x96xi1>
    %147 = vector.shape_cast %70 : vector<16x1xf32> to vector<16x1xf32>
    %148 = vector.broadcast %147 : vector<16x1xf32> to vector<16x96xf32>
    %149 = arith.select %146, %148, %137 : vector<16x96xi1>, vector<16x96xf32>
    %150 = arith.subf %7, %144 : vector<16x96xf32>
    %151 = arith.mulf %150, %149 : vector<16x96xf32>
    %c0_41 = arith.constant 0 : index
    %c0_42 = arith.constant 0 : index
    %152 = vector.load %arg3[%c0_41, %c0_42] : memref<96x128xf32, #tpu.memory_space<vmem>>, vector<96x128xf32>
    %cst_43 = arith.constant dense<0.000000e+00> : vector<16x128xf32>
    %153 = tpu.matmul %151, %152, %cst_43 {dimension_numbers = #tpu.dot_dimension_numbers<[1], [0], [0], [1], [0, 0, 1, 1], [], []>} : vector<16x96xf32>, vector<96x128xf32>, vector<16x128xf32> -> vector<16x128xf32>
    %c1 = arith.constant 1 : index
    %c0_44 = arith.constant 0 : index
    %154 = vector.load %arg4[%c1, %c0_44] : memref<8x128xf32, #tpu.memory_space<vmem>>, vector<1x128xf32>
    %155 = vector.broadcast %154 : vector<1x128xf32> to vector<16x128xf32>
    %156 = arith.addf %153, %155 : vector<16x128xf32>
    %cst_45 = arith.constant 0.000000e+00 : f32
    %157 = vector.broadcast %cst_45 : f32 to vector<16x128xf32>
    %158 = arith.maximumf %156, %157 : vector<16x128xf32>
    %159 = tpu.iota {dimensions = array<i32: 1>} : vector<1x128xi32>
    %160 = arith.mulf %158, %158 : vector<16x128xf32>
    %c64_i32 = arith.constant 64 : i32
    %161 = vector.broadcast %c64_i32 : i32 to vector<1x128xi32>
    %162 = arith.cmpi slt, %159, %161 : vector<1x128xi32>
    %cst_46 = arith.constant 0.000000e+00 : f32
    %163 = vector.shape_cast %162 : vector<1x128xi1> to vector<1x128xi1>
    %164 = vector.broadcast %163 : vector<1x128xi1> to vector<16x128xi1>
    %165 = vector.broadcast %cst_46 : f32 to vector<16x128xf32>
    %166 = arith.select %164, %158, %165 : vector<16x128xi1>, vector<16x128xf32>
    %cst_47 = arith.constant dense<0.000000e+00> : vector<16xf32>
    %167 = vector.multi_reduction <add>, %166, %cst_47 [1] : vector<16x128xf32> to vector<16xf32>
    %168 = vector.shape_cast %167 : vector<16xf32> to vector<16x1xf32>
    %cst_48 = arith.constant 0.000000e+00 : f32
    %169 = vector.shape_cast %162 : vector<1x128xi1> to vector<1x128xi1>
    %170 = vector.broadcast %169 : vector<1x128xi1> to vector<16x128xi1>
    %171 = vector.broadcast %cst_48 : f32 to vector<16x128xf32>
    %172 = arith.select %170, %160, %171 : vector<16x128xi1>, vector<16x128xf32>
    %cst_49 = arith.constant dense<0.000000e+00> : vector<16xf32>
    %173 = vector.multi_reduction <add>, %172, %cst_49 [1] : vector<16x128xf32> to vector<16xf32>
    %174 = vector.shape_cast %173 : vector<16xf32> to vector<16x1xf32>
    %cst_50 = arith.constant dense<0.000000e+00> : vector<16xf32>
    %175 = vector.multi_reduction <add>, %158, %cst_50 [1] : vector<16x128xf32> to vector<16xf32>
    %176 = vector.shape_cast %175 : vector<16xf32> to vector<16x1xf32>
    %cst_51 = arith.constant dense<0.000000e+00> : vector<16xf32>
    %177 = vector.multi_reduction <add>, %160, %cst_51 [1] : vector<16x128xf32> to vector<16xf32>
    %178 = vector.shape_cast %177 : vector<16xf32> to vector<16x1xf32>
    %cst_52 = arith.constant 0.000000e+00 : f32
    %179 = vector.broadcast %cst_52 : f32 to vector<16x1xf32>
    %180 = arith.subf %168, %179 : vector<16x1xf32>
    %cst_53 = arith.constant 1.562500e-02 : f32
    %181 = vector.broadcast %cst_53 : f32 to vector<16x1xf32>
    %182 = arith.mulf %180, %181 : vector<16x1xf32>
    %cst_54 = arith.constant 0.000000e+00 : f32
    %183 = vector.broadcast %cst_54 : f32 to vector<16x1xf32>
    %184 = arith.subf %174, %183 : vector<16x1xf32>
    %cst_55 = arith.constant 1.562500e-02 : f32
    %185 = vector.broadcast %cst_55 : f32 to vector<16x1xf32>
    %186 = arith.mulf %184, %185 : vector<16x1xf32>
    %187 = arith.mulf %182, %182 : vector<16x1xf32>
    %188 = arith.subf %186, %187 : vector<16x1xf32>
    %cst_56 = arith.constant 0.000000e+00 : f32
    %189 = vector.broadcast %cst_56 : f32 to vector<16x1xf32>
    %190 = arith.maximumf %188, %189 : vector<16x1xf32>
    %cst_57 = arith.constant 9.99999974E-6 : f32
    %191 = vector.broadcast %cst_57 : f32 to vector<16x1xf32>
    %192 = arith.addf %190, %191 : vector<16x1xf32>
    %193 = math.rsqrt %192 : vector<16x1xf32>
    %194 = arith.subf %176, %168 : vector<16x1xf32>
    %cst_58 = arith.constant 1.562500e-02 : f32
    %195 = vector.broadcast %cst_58 : f32 to vector<16x1xf32>
    %196 = arith.mulf %194, %195 : vector<16x1xf32>
    %197 = arith.subf %178, %174 : vector<16x1xf32>
    %cst_59 = arith.constant 1.562500e-02 : f32
    %198 = vector.broadcast %cst_59 : f32 to vector<16x1xf32>
    %199 = arith.mulf %197, %198 : vector<16x1xf32>
    %200 = arith.mulf %196, %196 : vector<16x1xf32>
    %201 = arith.subf %199, %200 : vector<16x1xf32>
    %cst_60 = arith.constant 0.000000e+00 : f32
    %202 = vector.broadcast %cst_60 : f32 to vector<16x1xf32>
    %203 = arith.maximumf %201, %202 : vector<16x1xf32>
    %cst_61 = arith.constant 9.99999974E-6 : f32
    %204 = vector.broadcast %cst_61 : f32 to vector<16x1xf32>
    %205 = arith.addf %203, %204 : vector<16x1xf32>
    %206 = math.rsqrt %205 : vector<16x1xf32>
    %c64_i32_62 = arith.constant 64 : i32
    %207 = vector.broadcast %c64_i32_62 : i32 to vector<1x128xi32>
    %208 = arith.cmpi slt, %159, %207 : vector<1x128xi32>
    %209 = vector.shape_cast %208 : vector<1x128xi1> to vector<1x128xi1>
    %210 = vector.broadcast %209 : vector<1x128xi1> to vector<16x128xi1>
    %211 = vector.shape_cast %182 : vector<16x1xf32> to vector<16x1xf32>
    %212 = vector.broadcast %211 : vector<16x1xf32> to vector<16x128xf32>
    %213 = vector.shape_cast %196 : vector<16x1xf32> to vector<16x1xf32>
    %214 = vector.broadcast %213 : vector<16x1xf32> to vector<16x128xf32>
    %215 = arith.select %210, %212, %214 : vector<16x128xi1>, vector<16x128xf32>
    %216 = vector.shape_cast %208 : vector<1x128xi1> to vector<1x128xi1>
    %217 = vector.broadcast %216 : vector<1x128xi1> to vector<16x128xi1>
    %218 = vector.shape_cast %193 : vector<16x1xf32> to vector<16x1xf32>
    %219 = vector.broadcast %218 : vector<16x1xf32> to vector<16x128xf32>
    %220 = vector.shape_cast %206 : vector<16x1xf32> to vector<16x1xf32>
    %221 = vector.broadcast %220 : vector<16x1xf32> to vector<16x128xf32>
    %222 = arith.select %217, %219, %221 : vector<16x128xi1>, vector<16x128xf32>
    %223 = arith.subf %158, %215 : vector<16x128xf32>
    %224 = arith.mulf %223, %222 : vector<16x128xf32>
    %c2 = arith.constant 2 : index
    %c0_63 = arith.constant 0 : index
    %225 = vector.load %arg4[%c2, %c0_63] : memref<8x128xf32, #tpu.memory_space<vmem>>, vector<1x128xf32>
    %226 = vector.broadcast %225 : vector<1x128xf32> to vector<16x128xf32>
    %227 = arith.mulf %224, %226 : vector<16x128xf32>
    %c3 = arith.constant 3 : index
    %c0_64 = arith.constant 0 : index
    %228 = vector.load %arg4[%c3, %c0_64] : memref<8x128xf32, #tpu.memory_space<vmem>>, vector<1x128xf32>
    %229 = vector.broadcast %228 : vector<1x128xf32> to vector<16x128xf32>
    %230 = arith.addf %227, %229 : vector<16x128xf32>
    %c0_65 = arith.constant 0 : index
    %c0_66 = arith.constant 0 : index
    %231 = vector.load %arg5[%c0_65, %c0_66] : memref<16x128xf32, #tpu.memory_space<vmem>>, vector<16x128xf32>
    tpu.vector_store %arg5[%c0_65, %c0_66], %230 {strides = array<i32>} : memref<16x128xf32, #tpu.memory_space<vmem>>, vector<16x128xf32>,
    return
  }
  func.func @transform_0(%arg0: i32) -> (i32, i32) {
    %c0_i32 = arith.constant 0 : i32
    %c0_i32_0 = arith.constant 0 : i32
    return %arg0, %c0_i32 : i32, i32
  }
  func.func @transform_1(%arg0: i32) -> (i32, i32) {
    %c0_i32 = arith.constant 0 : i32
    %c0_i32_0 = arith.constant 0 : i32
    %c0_i32_1 = arith.constant 0 : i32
    return %c0_i32, %c0_i32_0 : i32, i32
  }
  func.func @transform_2(%arg0: i32) -> (i32, i32) {
    %c0_i32 = arith.constant 0 : i32
    %c0_i32_0 = arith.constant 0 : i32
    %c0_i32_1 = arith.constant 0 : i32
    return %c0_i32, %c0_i32_0 : i32, i32
  }
  func.func @transform_3(%arg0: i32) -> (i32, i32) {
    %c0_i32 = arith.constant 0 : i32
    %c0_i32_0 = arith.constant 0 : i32
    %c0_i32_1 = arith.constant 0 : i32
    return %c0_i32, %c0_i32_0 : i32, i32
  }
  func.func @transform_4(%arg0: i32) -> (i32, i32) {
    %c0_i32 = arith.constant 0 : i32
    %c0_i32_0 = arith.constant 0 : i32
    return %arg0, %c0_i32 : i32, i32
  }
}

</mosaic_0001>

<bundles_post_ra>
// kernel: tpu_custom_call.1
= control target key start
LH: loop header
LB: loop body
LE: loop exit
PB: predicated region body
PF: predicated region fallthrough
CT: control target
= control target key end

     0   :  { %9 = vsyncpa [#allocation3], 0  ;;  %s994_s0 = inlined_call_operand.hbm [shape: f32[16,36], index: 0, kind: input, shape index: {}]   ;;  %s995_s1 = inlined_call_operand.hbm [shape: f32[36,96], index: 1, kind: input, shape index: {}]   ;;  %s996_s2 = inlined_call_operand.hbm [shape: f32[96,128], index: 2, kind: input, shape index: {}]   ;;  %s997_s3 = inlined_call_operand.vmem [shape: f32[8,128], index: 3, kind: input, shape index: {}]   ;;  %s998_s4 = inlined_call_operand.hbm [shape: f32[16,128], index: 4, kind: output, shape index: {}]  }
   0x1   :  { %10 = vsyncpa [#allocation6], 0 }
   0x2   :  { %11 = vsyncpa [#allocation4], 0  ;;  %s742_s15 = smov [#allocation5]   ;;  %s743_s17 = smov [#allocation2]  }
   0x3   :  { %s29_s16 = sshll.u32 %s742_s15, 4  ;;  %s17_s18 = sshll.u32 %s743_s17, 4  ;;  %s30_s16 = int_to_ptr.vmem [resolvable:$true] %s29_s16  ;;  %s773_s18 = int_to_ptr.vmem [resolvable:$true] %s17_s18 }
   0x4   :  { %s648_s21 = scalar_lea.hbm %s995_s1, 640 }
   0x5   :  { %p649_p0 = scmp.ne.s32.totalorder %s995_s1, %s648_s21  ;;  %p652_p1 = scmp.lt.u32.totalorder %s648_s21, %s995_s1 }
   0x7   :  { %p654_p2 = pnand %p652_p1, %p649_p0 }
   0x9   :  { %657 = shalt.err (!%p654_p2)
}
   0xa   :  { %s658_s26 = scalar_lea.vmem %s30_s16, 640  ;;  %p663_p4 = scmp.lt.s32.totalorder %s30_s16, %s30_s16 }
   0xb   :  { %p659_p3 = scmp.ne.s32.totalorder %s30_s16, %s658_s26  ;;  %p664_p5 = scmp.lt.s32.totalorder %s658_s26, %s658_s26 }
   0xd   :  { %p665_p6 = por %p664_p5, %p663_p4 }
   0xf   :  { %p666_p7 = pnand %p665_p6, %p659_p3 }
  0x11   :  { %669 = shalt.err (!%p666_p7)
}
  0x12   :  { %s744_s27 = smov 128   ;;  %s745_s28 = smov 8  }
  0x13   :  { %35 = dma.hbm_to_vmem [thread:$0]  %s995_s1, 640, %s30_s16, [#allocation6], %s744_s27, %s744_s27, %s745_s28  }
  0x14   :  { %s670_s7 = scalar_lea.hbm %s994_s0, 256 }
  0x15   :  { %p671_p8 = scmp.ne.s32.totalorder %s994_s0, %s670_s7  ;;  %p674_p9 = scmp.lt.u32.totalorder %s670_s7, %s994_s0 }
  0x17   :  { %p676_p10 = pnand %p674_p9, %p671_p8 }
  0x19   :  { %679 = shalt.err (!%p676_p10)
}
  0x1a   :  { %s680_s12 = scalar_lea.vmem %s773_s18, 256  ;;  %p685_p12 = scmp.lt.s32.totalorder %s773_s18, %s773_s18 }
  0x1b   :  { %p681_p11 = scmp.ne.s32.totalorder %s773_s18, %s680_s12  ;;  %p686_p13 = scmp.lt.s32.totalorder %s680_s12, %s680_s12 }
  0x1d   :  { %p687_p0 = por %p686_p13, %p685_p12 }
  0x1f   :  { %p688_p1 = pnand %p687_p0, %p681_p11 }
  0x21   :  { %691 = shalt.err (!%p688_p1)
}
  0x22   :  { %23 = dma.hbm_to_vmem [thread:$0]  %s994_s0, 256, %s773_s18, [#allocation3], %s744_s27, %s744_s27, %s745_s28  }
  0x23   :  { %s746_s14 = smov [#allocation7]   ;;  %s692_s19 = scalar_lea.hbm %s996_s2, 1536 }
  0x24   :  { %s41_s15 = sshll.u32 %s746_s14, 4  ;;  %p693_p2 = scmp.ne.s32.totalorder %s996_s2, %s692_s19  ;;  %s42_s15 = int_to_ptr.vmem [resolvable:$true] %s41_s15 }
  0x25   :  { %p696_p3 = scmp.lt.u32.totalorder %s692_s19, %s996_s2 }
  0x27   :  { %p698_p4 = pnand %p696_p3, %p693_p2 }
  0x29   :  { %701 = shalt.err (!%p698_p4)
}
  0x2a   :  { %s702_s24 = scalar_lea.vmem %s42_s15, 1536  ;;  %p707_p6 = scmp.lt.s32.totalorder %s42_s15, %s42_s15 }
  0x2b   :  { %p703_p5 = scmp.ne.s32.totalorder %s42_s15, %s702_s24  ;;  %p708_p7 = scmp.lt.s32.totalorder %s702_s24, %s702_s24 }
  0x2d   :  { %p709_p8 = por %p708_p7, %p707_p6 }
  0x2f   :  { %p710_p9 = pnand %p709_p8, %p703_p5 }
  0x31   :  { %713 = shalt.err (!%p710_p9)
}
  0x32   :  { %47 = dma.hbm_to_vmem [thread:$0]  %s996_s2, 1536, %s42_s15, [#allocation6], %s744_s27, %s744_s27, %s745_s28  }
  0x33   :  { %736 = dma.done.wait [#allocation3], 256  }
  0x34   :  { %737 = vsyncadd [#allocation3], 4294967040 }
  0x35   :  { %738 = dma.done.wait [#allocation6], 2176  }
  0x36   :  { %739 = vsyncadd [#allocation6], 4294965120  ;;  %vm71_vm0 = vcmask 293888   ;;  %v61_v0 = vld [vmem:[#allocation5] sm:$0xff]  ;;  %v62_v1 = vld [vmem:[#allocation5 + $0x8] sm:$0xff]  ;;  %vm78_vm1 = vcmask 1043456   ;;  %v159_v9 = vlaneseq }
  0x37   :  { %v63_v2 = vld [vmem:[#allocation5 + $0x10] sm:$0xff]  ;;  %v586_v3 = vpack.c.bf16 %v62_v1, %v61_v0  ;;  %v64_v4 = vld [vmem:[#allocation5 + $0x18] sm:$0xff]  ;;  %v65_v7 = vld [vmem:[#allocation5 + $0x20] sm:$0xf]  ;;  %vm168_vm2 = vcmask 785408   ;;  %s747_s8 = smov [#allocation8]  }
  0x38   :  { %v59_v5 = vld [vmem:[#allocation2] sm:$0xff]  ;;  %v590_v6 = vpack.c.bf16 %v64_v4, %v63_v2  ;;  %v60_v8 = vld [vmem:[#allocation2 + $0x8] sm:$0xff]  ;;  %v830_v11 = vand.u32 127, %v159_v9  ;;  %v317_v48 = vld [vmem:[#allocation7] sm:$0xff]  ;;  %s503_s9 = sshll.u32 %s747_s8, 4  ;;  %s504_s9 = int_to_ptr.vmem [resolvable:$true] %s503_s9 }
  0x39   :  { %556 = vmatprep.mubr.msk.f32.mxu0 %vm71_vm0, %v59_v5  ;;  %587 = vmatprep.subr.bf16.mxu0 %v586_v3  ;;  %v516_v10 = vld [vmem:[%s997_s3] ss:$0 sm:$0xff]  ;;  %v319_v51 = vld [vmem:[#allocation7 + $0x10] sm:$0xff]  ;;  %v320_v52 = vld [vmem:[#allocation7 + $0x18] sm:$0xff]  ;;  %s714_s10 = scalar_lea.vmem %s504_s9, 256  ;;  %p719_p11 = scmp.lt.s32.totalorder %s504_s9, %s504_s9 }
  0x3a   :  { %589 = vmatpush3.bf16.msra.mxu0 %v586_v3  ;;  %vm183_vm3 = vcmp.lt.s32.totalorder %v830_v11, 48  ;;  %vm202_vm4 = vcmp.lt.s32.totalorder %v830_v11, 80  ;;  %vm163_vm5 = vcmp.lt.s32.totalorder %v830_v11, 32  ;;  %v318_v49 = vld [vmem:[#allocation7 + $0x8] sm:$0xff]  ;;  %v598_v53 = vpack.c.bf16 %v320_v52, %v319_v51  ;;  %v321_v54 = vld [vmem:[#allocation7 + $0x20] sm:$0xff]  ;;  %v323_v56 = vld [vmem:[#allocation7 + $0x30] sm:$0xff]  ;;  %p715_p10 = scmp.ne.s32.totalorder %s504_s9, %s714_s10  ;;  %p720_p12 = scmp.lt.s32.totalorder %s714_s10, %s714_s10 }
  0x3b   :  { %591 = vmatprep.subr.bf16.mxu0 %v590_v6  ;;  %v594_v50 = vpack.c.bf16 %v318_v49, %v317_v48  ;;  %v322_v55 = vld [vmem:[#allocation7 + $0x28] sm:$0xff]  ;;  %v324_v58 = vld [vmem:[#allocation7 + $0x38] sm:$0xff]  ;;  %v325_v60 = vld [vmem:[#allocation7 + $0x40] sm:$0xff]  ;;  %vm419_vm6 = vcmp.lt.s32.totalorder %v830_v11, 64 }
  0x3c   :  { %v602_v57 = vpack.c.bf16 %v322_v55, %v321_v54  ;;  %v606_v59 = vpack.c.bf16 %v324_v58, %v323_v56  ;;  %v326_v61 = vld [vmem:[#allocation7 + $0x48] sm:$0xff]  ;;  %v327_v63 = vld [vmem:[#allocation7 + $0x50] sm:$0xff]  ;;  %v328_v0 = vld [vmem:[#allocation7 + $0x58] sm:$0xff]  ;;  %p721_p13 = por %p720_p12, %p719_p11 }
  0x3d   :  { %595 = vmatprep.subr.bf16.mxu1 %v594_v50  ;;  %v610_v62 = vpack.c.bf16 %v326_v61, %v325_v60  ;;  %v614_v1 = vpack.c.bf16 %v328_v0, %v327_v63 }
  0x3e   :  { %593 = vmatpush3.bf16.msra.mxu0 %v590_v6  ;;  %597 = vmatpush3.bf16.msra.mxu1 %v594_v50  ;;  %p722_p0 = pnand %p721_p13, %p715_p10 }
  0x3f   :  { %554 = vmatprep.subr.msk.mxu0 %vm78_vm1, %v65_v7  ;;  %599 = vmatprep.subr.bf16.mxu1 %v598_v53 }
  0x42   :  { %555 = vmatpush3.msk.msra.mxu0 %vm78_vm1, %v65_v7  ;;  %601 = vmatpush3.bf16.msra.mxu1 %v598_v53 }
  0x43   :  { %557 = vmatmul.mubr.msk.f32.vlgmr.msra.gmra.mrb[0].mxu0 %vm71_vm0, %v60_v8  ;;  %603 = vmatprep.subr.bf16.mxu1 %v602_v57 }
  0x46   :  { %605 = vmatpush3.bf16.msra.mxu1 %v602_v57 }
  0x47   :  { %607 = vmatprep.subr.bf16.mxu1 %v606_v59 }
  0x4a   :  { %609 = vmatpush3.bf16.msra.mxu1 %v606_v59 }
  0x4b   :  { %611 = vmatprep.subr.bf16.mxu1 %v610_v62 }
  0x4e   :  { %613 = vmatpush3.bf16.msra.mxu1 %v610_v62 }
  0x4f   :  { %615 = vmatprep.subr.bf16.mxu1 %v614_v1 }
  0x52   :  { %617 = vmatpush3.bf16.msra.mxu1 %v614_v1 }
 0x116   :  { %v558_v12 = vpop.f32.mrb[0].mxu0 }
 0x117   :  { %v154_v13 = vadd.f32 %v558_v12, %v516_v10  ;;  %v148_v14 = vpop.f32.mrb[1].mxu0 }
 0x118   :  { %v149_v15 = vadd.f32 %v516_v10, %v148_v14 }
 0x119   :  { %v832_v16 = vmax.f32 %v154_v13, 0.0 }
 0x11a   :  { %v835_v17 = vmax.f32 %v149_v15, 0.0 }
 0x11b   :  { %v224_v18 = vsel %vm168_vm2, %v832_v16, 0.0  ;;  %v187_v20 = vsel %vm183_vm3, %v832_v16, 0.0  ;;  %v206_v21 = vsel %vm202_vm4, %v832_v16, 0.0  ;;  %v167_v25 = vsel %vm163_vm5, %v832_v16, 0.0 }
 0x11c   :  { %225 = vadd.xlane.f32.xlu0 %v224_v18  ;;  %v221_v19 = vsel %vm168_vm2, %v835_v17, 0.0  ;;  %v191_v22 = vsel %vm168_vm2, %v187_v20, 0.0  ;;  %v210_v23 = vsel %vm168_vm2, %v206_v21, 0.0  ;;  %v186_v24 = vsel %vm183_vm3, %v835_v17, 0.0 }
 0x11d   :  { %222 = vadd.xlane.f32.xlu1 %v221_v19  ;;  %v188_v26 = vsel %vm168_vm2, %v186_v24, 0.0  ;;  %v172_v27 = vsel %vm168_vm2, %v167_v25, 0.0  ;;  %v205_v28 = vsel %vm202_vm4, %v835_v17, 0.0  ;;  %v166_v29 = vsel %vm163_vm5, %v835_v17, 0.0 }
 0x11e   :  { %v162_v30 = vmul.f32 %v832_v16, %v832_v16  ;;  %v207_v31 = vsel %vm168_vm2, %v205_v28, 0.0  ;;  %v161_v32 = vmul.f32 %v835_v17, %v835_v17  ;;  %v169_v33 = vsel %vm168_vm2, %v166_v29, 0.0 }
 0x120   :  { %192 = vadd.xlane.f32.xlu0 %v191_v22  ;;  %v214_v34 = vsel %vm202_vm4, %v162_v30, 0.0  ;;  %v227_v35 = vsel %vm168_vm2, %v161_v32, 0.0  ;;  %v195_v37 = vsel %vm183_vm3, %v162_v30, 0.0  ;;  %v213_v38 = vsel %vm202_vm4, %v161_v32, 0.0 }
 0x121   :  { %211 = vadd.xlane.f32.xlu1 %v210_v23  ;;  %v218_v36 = vsel %vm168_vm2, %v214_v34, 0.0  ;;  %v199_v39 = vsel %vm168_vm2, %v195_v37, 0.0  ;;  %v215_v40 = vsel %vm168_vm2, %v213_v38, 0.0  ;;  %v194_v41 = vsel %vm183_vm3, %v161_v32, 0.0 }
 0x122   :  { %v175_v42 = vsel %vm163_vm5, %v161_v32, 0.0  ;;  %v196_v43 = vsel %vm168_vm2, %v194_v41, 0.0  ;;  %v176_v45 = vsel %vm163_vm5, %v162_v30, 0.0  ;;  %v230_v46 = vsel %vm168_vm2, %v162_v30, 0.0 }
 0x123   :  { %v177_v44 = vsel %vm168_vm2, %v175_v42, 0.0  ;;  %v180_v47 = vsel %vm168_vm2, %v176_v45, 0.0 }
 0x124   :  { %189 = vadd.xlane.f32.xlu0 %v188_v26 }
 0x125   :  { %173 = vadd.xlane.f32.xlu1 %v172_v27 }
 0x128   :  { %208 = vadd.xlane.f32.xlu0 %v207_v31 }
 0x129   :  { %170 = vadd.xlane.f32.xlu1 %v169_v33 }
 0x12c   :  { %228 = vadd.xlane.f32.xlu0 %v227_v35 }
 0x12d   :  { %219 = vadd.xlane.f32.xlu1 %v218_v36 }
 0x130   :  { %200 = vadd.xlane.f32.xlu0 %v199_v39 }
 0x131   :  { %216 = vadd.xlane.f32.xlu1 %v215_v40 }
 0x134   :  { %197 = vadd.xlane.f32.xlu0 %v196_v43 }
 0x135   :  { %178 = vadd.xlane.f32.xlu1 %v177_v44 }
 0x138   :  { %231 = vadd.xlane.f32.xlu0 %v230_v46 }
 0x139   :  { %181 = vadd.xlane.f32.xlu1 %v180_v47 }
 0x1a9   :  { %v226_v2 = vpop.xlane.xlu0 %225 }
 0x1aa   :  { %v223_v3 = vpop.xlane.xlu1 %222 }
 0x1ad   :  { %v193_v4 = vpop.xlane.xlu0 %192 }
 0x1ae   :  { %v212_v5 = vpop.xlane.xlu1 %211 }
 0x1af   :  { %v266_v10 = vsub.f32 %v212_v5, %v193_v4  ;;  %v284_v24 = vsub.f32 %v226_v2, %v212_v5 }
 0x1b1   :  { %v190_v6 = vpop.xlane.xlu0 %189  ;;  %v891_v15 = vmul.f32 0.03125, %v266_v10  ;;  %v286_v43 = vmul.f32 0.0625, %v284_v24 }
 0x1b2   :  { %v174_v7 = vpop.xlane.xlu1 %173 }
 0x1b3   :  { %v274_v27 = vmul.f32 %v891_v15, %v891_v15  ;;  %v248_v28 = vsub.f32 %v193_v4, %v174_v7  ;;  %v901_v35 = vmul.f32 0.03125, %v174_v7  ;;  %v292_v61 = vmul.f32 %v286_v43, %v286_v43 }
 0x1b5   :  { %v209_v8 = vpop.xlane.xlu0 %208  ;;  %v250_v44 = vmul.f32 0.0625, %v248_v28  ;;  %v238_v52 = vmul.f32 %v901_v35, %v901_v35  ;;  %v302_v28 = vsel %vm202_vm4, %v891_v15, %v286_v43 }
 0x1b6   :  { %v171_v9 = vpop.xlane.xlu1 %170  ;;  %v283_v12 = vsub.f32 %v223_v3, %v209_v8  ;;  %v265_v18 = vsub.f32 %v209_v8, %v190_v6 }
 0x1b7   :  { %v247_v20 = vsub.f32 %v190_v6, %v171_v9  ;;  %v895_v25 = vmul.f32 0.03125, %v171_v9  ;;  %v256_v1 = vmul.f32 %v250_v44, %v250_v44 }
 0x1b8   :  { %v893_v19 = vmul.f32 0.0625, %v283_v12  ;;  %v267_v29 = vmul.f32 0.03125, %v265_v18 }
 0x1b9   :  { %v229_v13 = vpop.xlane.xlu0 %228  ;;  %v249_v32 = vmul.f32 0.0625, %v247_v20  ;;  %v237_v39 = vmul.f32 %v895_v25, %v895_v25 }
 0x1ba   :  { %v220_v14 = vpop.xlane.xlu1 %219  ;;  %v291_v31 = vmul.f32 %v893_v19, %v893_v19  ;;  %v273_v45 = vmul.f32 %v267_v29, %v267_v29  ;;  %v301_v20 = vsel %vm202_vm4, %v267_v29, %v893_v19  ;;  %v306_v29 = vsel %vm183_vm3, %v250_v44, %v302_v28 }
 0x1bb   :  { %v255_v47 = vmul.f32 %v249_v32, %v249_v32  ;;  %v310_v15 = vsel %vm163_vm5, %v901_v35, %v306_v29  ;;  %v520_v35 = vld [vmem:[%s997_s3 + $0x1] ss:$0 sm:$0xff] }
 0x1bd   :  { %v201_v21 = vpop.xlane.xlu0 %200 }
 0x1be   :  { %v270_v22 = vsub.f32 %v220_v14, %v201_v21  ;;  %v217_v23 = vpop.xlane.xlu1 %216 }
 0x1bf   :  { %v287_v26 = vsub.f32 %v229_v13, %v217_v23 }
 0x1c0   :  { %v272_v30 = vmul.f32 0.03125, %v270_v22 }
 0x1c1   :  { %v289_v33 = vmul.f32 0.0625, %v287_v26  ;;  %v198_v34 = vpop.xlane.xlu0 %197 }
 0x1c2   :  { %v276_v36 = vsub.f32 %v272_v30, %v274_v27  ;;  %v269_v37 = vsub.f32 %v217_v23, %v198_v34  ;;  %v179_v38 = vpop.xlane.xlu1 %178  ;;  %v305_v23 = vsel %vm183_vm3, %v249_v32, %v301_v20 }
 0x1c3   :  { %v293_v40 = vsub.f32 %v289_v33, %v291_v31  ;;  %v235_v41 = vmul.f32 0.03125, %v179_v38  ;;  %v251_v42 = vsub.f32 %v198_v34, %v179_v38  ;;  %v309_v26 = vsel %vm163_vm5, %v895_v25, %v305_v23 }
 0x1c4   :  { %v271_v46 = vmul.f32 0.03125, %v269_v37  ;;  %v278_v53 = vmax.f32 %v276_v36, 0.0  ;;  %v313_v33 = vsub.f32 %v835_v17, %v309_v26 }
 0x1c5   :  { %v295_v48 = vmax.f32 %v293_v40, 0.0  ;;  %v239_v49 = vsub.f32 %v235_v41, %v237_v39  ;;  %v253_v50 = vmul.f32 0.0625, %v251_v42  ;;  %v232_v51 = vpop.xlane.xlu0 %231  ;;  %v314_v41 = vsub.f32 %v832_v16, %v310_v15 }
 0x1c6   :  { %v275_v54 = vsub.f32 %v271_v46, %v273_v45  ;;  %v288_v55 = vsub.f32 %v232_v51, %v220_v14  ;;  %v182_v56 = vpop.xlane.xlu1 %181  ;;  %v280_v8 = vadd.f32 1e-05, %v278_v53 }
 0x1c7   :  { %v297_v57 = vadd.f32 1e-05, %v295_v48  ;;  %v241_v58 = vmax.f32 %v239_v49, 0.0  ;;  %v257_v59 = vsub.f32 %v253_v50, %v255_v47  ;;  %v236_v60 = vmul.f32 0.03125, %v182_v56 }
 0x1c8   :  { %v277_v62 = vmax.f32 %v275_v54, 0.0  ;;  %v290_v63 = vmul.f32 0.0625, %v288_v55  ;;  %v252_v0 = vsub.f32 %v201_v21, %v182_v56 }
 0x1c9   :  { %v259_v2 = vmax.f32 %v257_v59, 0.0  ;;  %v240_v3 = vsub.f32 %v236_v60, %v238_v52  ;;  %v243_v5 = vadd.f32 1e-05, %v241_v58  ;;  %624 = vrsqrt.f32 %v297_v57 }
 0x1ca   :  { %v279_v4 = vadd.f32 1e-05, %v277_v62  ;;  %v294_v6 = vsub.f32 %v290_v63, %v292_v61  ;;  %v254_v7 = vmul.f32 0.0625, %v252_v0 }
 0x1cb   :  { %v261_v9 = vadd.f32 1e-05, %v259_v2  ;;  %v242_v10 = vmax.f32 %v240_v3, 0.0 }
 0x1cc   :  { %626 = vrsqrt.f32 %v279_v4  ;;  %v296_v12 = vmax.f32 %v294_v6, 0.0  ;;  %v258_v13 = vsub.f32 %v254_v7, %v256_v1 }
 0x1cd   :  { %628 = vrsqrt.f32 %v261_v9  ;;  %v244_v21 = vadd.f32 1e-05, %v242_v10 }
 0x1ce   :  { %630 = vrsqrt.f32 %v243_v5  ;;  %v298_v14 = vadd.f32 1e-05, %v296_v12  ;;  %v260_v18 = vmax.f32 %v258_v13, 0.0 }
 0x1cf   :  { %632 = vrsqrt.f32 %v280_v8 }
 0x1d0   :  { %634 = vrsqrt.f32 %v298_v14  ;;  %v262_v22 = vadd.f32 1e-05, %v260_v18 }
 0x1d2   :  { %636 = vrsqrt.f32 %v262_v22 }
 0x1d3   :  { %638 = vrsqrt.f32 %v244_v21  ;;  %v625_v24 = vpop.eup %624 }
 0x1d6   :  { %v627_v27 = vpop.eup %626 }
 0x1d7   :  { %v629_v19 = vpop.eup %628  ;;  %v303_v30 = vsel %vm202_vm4, %v627_v27, %v625_v24 }
 0x1d8   :  { %v631_v31 = vpop.eup %630  ;;  %v307_v32 = vsel %vm183_vm3, %v629_v19, %v303_v30 }
 0x1d9   :  { %v633_v34 = vpop.eup %632  ;;  %v311_v25 = vsel %vm163_vm5, %v631_v31, %v307_v32 }
 0x1da   :  { %v635_v36 = vpop.eup %634  ;;  %v315_v37 = vmul.f32 %v313_v33, %v311_v25 }
 0x1db   :  { %v304_v38 = vsel %vm202_vm4, %v633_v34, %v635_v36 }
 0x1dc   :  { %v637_v39 = vpop.eup %636  ;;  %583 = vmatprep.mubr.msk.f32.mxu1 %vm168_vm2, %v315_v37 }
 0x1dd   :  { %v639_v40 = vpop.eup %638  ;;  %v308_v17 = vsel %vm183_vm3, %v637_v39, %v304_v38 }
 0x1de   :  { %v312_v42 = vsel %vm163_vm5, %v639_v40, %v308_v17  ;;  %v523_v40 = vld [vmem:[%s997_s3 + $0x2] ss:$0 sm:$0xff] }
 0x1df   :  { %v316_v43 = vmul.f32 %v314_v41, %v312_v42 }
 0x1e1   :  { %584 = vmatmul.mubr.msk.f32.vlgmr.msra.gmra.mrb[0].mxu1 %vm168_vm2, %v316_v43  ;;  %v524_v43 = vld [vmem:[%s997_s3 + $0x3] ss:$0 sm:$0xff] }
 0x2b4   :  { %v585_v44 = vpop.f32.mrb[0].mxu1 }
 0x2b5   :  { %v412_v45 = vadd.f32 %v585_v44, %v520_v35  ;;  %v406_v46 = vpop.f32.mrb[1].mxu1 }
 0x2b6   :  { %v407_v47 = vadd.f32 %v520_v35, %v406_v46 }
 0x2b7   :  { %v942_v48 = vmax.f32 %v412_v45, 0.0 }
 0x2b8   :  { %v944_v16 = vmax.f32 %v407_v47, 0.0 }
 0x2b9   :  { %436 = vadd.xlane.f32.xlu1 %v942_v48  ;;  %v423_v49 = vsel %vm419_vm6, %v942_v48, 0.0  ;;  %v418_v50 = vmul.f32 %v942_v48, %v942_v48 }
 0x2ba   :  { %434 = vadd.xlane.f32.xlu0 %v944_v16  ;;  %v422_v51 = vsel %vm419_vm6, %v944_v16, 0.0  ;;  %v417_v52 = vmul.f32 %v944_v16, %v944_v16 }
 0x2bb   :  { %v429_v53 = vsel %vm419_vm6, %v418_v50, 0.0 }
 0x2bc   :  { %v428_v54 = vsel %vm419_vm6, %v417_v52, 0.0 }
 0x2bd   :  { %426 = vadd.xlane.f32.xlu1 %v423_v49 }
 0x2be   :  { %424 = vadd.xlane.f32.xlu0 %v422_v51 }
 0x2c1   :  { %432 = vadd.xlane.f32.xlu1 %v429_v53 }
 0x2c2   :  { %430 = vadd.xlane.f32.xlu0 %v428_v54 }
 0x2c5   :  { %440 = vadd.xlane.f32.xlu1 %v418_v50 }
 0x2c6   :  { %438 = vadd.xlane.f32.xlu0 %v417_v52 }
 0x346   :  { %v437_v55 = vpop.xlane.xlu1 %436 }
 0x347   :  { %v435_v56 = vpop.xlane.xlu0 %434 }
 0x34a   :  { %v427_v57 = vpop.xlane.xlu1 %426 }
 0x34b   :  { %v443_v58 = vmul.f32 0.015625, %v427_v57  ;;  %v425_v59 = vpop.xlane.xlu0 %424  ;;  %v457_v61 = vsub.f32 %v437_v55, %v427_v57 }
 0x34c   :  { %v442_v60 = vmul.f32 0.015625, %v425_v59  ;;  %v456_v62 = vsub.f32 %v435_v56, %v425_v59 }
 0x34d   :  { %v447_v0 = vmul.f32 %v443_v58, %v443_v58  ;;  %v459_v5 = vmul.f32 0.015625, %v457_v61 }
 0x34e   :  { %v433_v63 = vpop.xlane.xlu1 %432  ;;  %v446_v3 = vmul.f32 %v442_v60, %v442_v60  ;;  %v458_v7 = vmul.f32 0.015625, %v456_v62 }
 0x34f   :  { %v445_v1 = vmul.f32 0.015625, %v433_v63  ;;  %v431_v2 = vpop.xlane.xlu0 %430  ;;  %v465_v20 = vmul.f32 %v459_v5, %v459_v5  ;;  %v475_v32 = vsel %vm419_vm6, %v443_v58, %v459_v5 }
 0x350   :  { %v444_v4 = vmul.f32 0.015625, %v431_v2  ;;  %v464_v22 = vmul.f32 %v458_v7, %v458_v7  ;;  %v474_v34 = vsel %vm419_vm6, %v442_v60, %v458_v7  ;;  %v479_v15 = vsub.f32 %v942_v48, %v475_v32 }
 0x351   :  { %v449_v6 = vsub.f32 %v445_v1, %v447_v0  ;;  %v478_v38 = vsub.f32 %v944_v16, %v474_v34 }
 0x352   :  { %v448_v8 = vsub.f32 %v444_v4, %v446_v3  ;;  %v441_v9 = vpop.xlane.xlu1 %440 }
 0x353   :  { %v451_v10 = vmax.f32 %v449_v6, 0.0  ;;  %v461_v12 = vsub.f32 %v441_v9, %v433_v63  ;;  %v439_v13 = vpop.xlane.xlu0 %438 }
 0x354   :  { %v450_v14 = vmax.f32 %v448_v8, 0.0  ;;  %v460_v18 = vsub.f32 %v439_v13, %v431_v2 }
 0x355   :  { %v463_v21 = vmul.f32 0.015625, %v461_v12  ;;  %v453_v24 = vadd.f32 1e-05, %v451_v10 }
 0x356   :  { %v462_v23 = vmul.f32 0.015625, %v460_v18  ;;  %v452_v27 = vadd.f32 1e-05, %v450_v14 }
 0x357   :  { %v467_v26 = vsub.f32 %v463_v21, %v465_v20  ;;  %640 = vrsqrt.f32 %v453_v24 }
 0x358   :  { %v466_v28 = vsub.f32 %v462_v23, %v464_v22  ;;  %642 = vrsqrt.f32 %v452_v27 }
 0x359   :  { %v469_v19 = vmax.f32 %v467_v26, 0.0 }
 0x35a   :  { %v468_v29 = vmax.f32 %v466_v28, 0.0 }
 0x35b   :  { %v471_v30 = vadd.f32 1e-05, %v469_v19 }
 0x35c   :  { %v470_v31 = vadd.f32 1e-05, %v468_v29 }
 0x35d   :  { %644 = vrsqrt.f32 %v471_v30 }
 0x35e   :  { %646 = vrsqrt.f32 %v470_v31 }
 0x361   :  { %v641_v33 = vpop.eup %640 }
 0x362   :  { %v643_v25 = vpop.eup %642 }
 0x367   :  { %v645_v36 = vpop.eup %644 }
 0x368   :  { %v647_v37 = vpop.eup %646  ;;  %v477_v39 = vsel %vm419_vm6, %v641_v33, %v645_v36 }
 0x369   :  { %v476_v41 = vsel %vm419_vm6, %v643_v25, %v647_v37  ;;  %v481_v17 = vmul.f32 %v479_v15, %v477_v39 }
 0x36a   :  { %v480_v42 = vmul.f32 %v478_v38, %v476_v41 }
 0x36b   :  { %v488_v35 = vmul.f32 %v523_v40, %v481_v17 }
 0x36c   :  { %v487_v44 = vmul.f32 %v523_v40, %v480_v42 }
 0x36d   :  { %v495_v45 = vadd.f32 %v524_v43, %v488_v35 }
 0x36e   :  { %v494_v46 = vadd.f32 %v524_v43, %v487_v44 }
 0x36f   :  { %497 = vst [vmem:[#allocation8 + $0x8] sm:$0xff] %v495_v45 }
 0x370   :  { %496 = vst [vmem:[#allocation8] sm:$0xff] %v494_v46 }
 0x371   :  { %725 = shalt.err (!%p722_p0)
}
 0x372   :  { %s726_s3 = scalar_lea.hbm %s998_s4, 256 }
 0x373   :  { %p727_p1 = scmp.ne.s32.totalorder %s998_s4, %s726_s3  ;;  %p730_p2 = scmp.lt.u32.totalorder %s726_s3, %s998_s4 }
 0x375   :  { %p732_p3 = pnand %p730_p2, %p727_p1 }
 0x377   :  { %735 = shalt.err (!%p732_p3)
}
 0x378   :  { %509 = dma.vmem_to_hbm [thread:$0]  %s504_s9, 256, %s998_s4, [#allocation4], %s744_s27, %s744_s27, %s745_s28  }
 0x379   :  { %740 = dma.done.wait [#allocation4], 256  }
 0x37a   :  { %741 = vsyncadd [#allocation4], 4294967040 }
 0x37b   :  { %513 = vsyncpa [#allocation3], 1 }
 0x37c   :  { %514 = vsyncpa [#allocation6], 1 }
 0x37d   :  { %515 = vsyncpa [#allocation4], 1 }

</bundles_post_ra>
